<compile_context>
chip_gen: v7x
topology: tpu7x:2x2x1
jax: 0.10.0
libtpu: 0.0.40
codegen_flags: <defaults>
</compile_context>

<pallas_src>
import jax
import jax.numpy as jnp
from jax import lax
from jax.experimental import pallas as pl
from jax.experimental.pallas import tpu as pltpu


def _round_up(x, m):
    return -(-x // m) * m


def _make_kernel(CO, H, W, TC, nc, padl, padr):
    HW = H * W
    ROWS = 9 * CO
    taps = [(kh, kw) for kh in range(3) for kw in range(3)]

    def kernel(x_ref, w_ref, b_ref, m_ref, o_ref, accp_ref):
        # x_ref   : (1, TC, HW) f32   channel tile, spatial flattened on lanes
        # w_ref   : (ROWS, Cp)  bf16  resident weights, row = (kh*3+kw)*CO+co
        # b_ref   : (CO, 1)     f32   conv bias
        # m_ref   : (2, HW)     f32   horizontal-boundary valid masks
        # o_ref   : (1, CO, HW) f32   output block (revisited over c)
        # accp_ref: (ROWS, padl+HW+padr) f32  zero-margined tap accumulator
        c = pl.program_id(1)

        # --- (27, TC) bf16 @ (TC, HW) bf16 -> (27, HW) f32 on the MXU -------
        xb = x_ref[0].astype(jnp.bfloat16)
        if nc == 1:
            wt = w_ref[...]
        else:
            wt = w_ref[:, pl.ds(c * TC, TC)]
        partial = jnp.dot(wt, xb, preferred_element_type=jnp.float32)

        @pl.when(c == 0)
        def _():
            # Re-zero the halo margins every image (megacore-safe), then
            # write the first partial into the 128-aligned middle window.
            accp_ref[:, :padl] = jnp.zeros((ROWS, padl), jnp.float32)
            accp_ref[:, padl + HW:padl + HW + padr] = jnp.zeros(
                (ROWS, padr), jnp.float32)
            accp_ref[:, padl:padl + HW] = partial

        @pl.when(c > 0)
        def _():
            accp_ref[:, padl:padl + HW] = accp_ref[:, padl:padl + HW] + partial

        # --- last channel tile: fold 9 taps, add bias, L2-normalize ---------
        @pl.when(c == nc - 1)
        def _():
            acc = jnp.zeros((CO, HW), jnp.float32)
            for t, (kh, kw) in enumerate(taps):
                off = padl + (kh - 1) * W + (kw - 1)
                s = accp_ref[CO * t:CO * (t + 1), off:off + HW]   # (CO, HW)
                if kw == 0:                  # reading column w-1: invalid at w=0
                    s = s * m_ref[0:1, :]
                elif kw == 2:                # reading column w+1: invalid at w=W-1
                    s = s * m_ref[1:2, :]
                acc = acc + s
            acc = acc + b_ref[...]                                # (CO,1) bcast
            sq = jnp.sum(acc * acc, axis=0, keepdims=True)        # (1, HW)
            inv = lax.rsqrt(jnp.maximum(sq, 1e-24))               # EUP
            o_ref[0] = (acc * inv).astype(o_ref.dtype)

    return kernel


def normal_head_pallas(x_nchw, weight_oihw, bias):
    """x_nchw: (N, C, H, W) f32.  weight_oihw: (CO, C, 3, 3).  bias: (CO,)."""
    N, C, H, W = x_nchw.shape
    CO = weight_oihw.shape[0]
    HW = H * W
    ROWS = 9 * CO

    # ---- generation-aware VMEM budget --------------------------------------
    try:
        cap = int(getattr(pltpu.get_tpu_info(), "vmem_capacity_bytes", 64 << 20))
    except Exception:  # pragma: no cover - off-TPU fallback
        cap = 64 << 20
    vmem_limit = int(min(cap * 3 // 4, 100 << 20))   # ~96 MiB v5e/v6e, ~48 MiB v7x

    # Bytes not proportional to TC: tap accumulator + matmul product + fold
    # temporaries + output/mask blocks (generous flat estimate).
    fold_bytes = 400 * HW + (2 << 20)
    avail = max(vmem_limit - fold_bytes, 1 << 20)
    # The f32 x block is double-buffered and cast to bf16 in-kernel (~2.5x).
    tc_max = max(8, int(avail * 2 // 5) // (HW * 4) // 8 * 8)

    x32 = x_nchw.astype(jnp.float32)
    if C <= tc_max:
        nc, TC, Cp = 1, C, C
        x_flat = x32.reshape(N, C, HW)                       # free, no copy
    else:
        nc = -(-C // tc_max)
        TC = _round_up(-(-C // nc), 8)
        Cp = TC * nc
        # TODO(synk): this large-C path materializes one zero-padded copy of x;
        # halo-ed spatial tiling would remove it.
        x_flat = jnp.pad(x32.reshape(N, C, HW), ((0, 0), (0, Cp - C), (0, 0)))

    # weights: OIHW -> (27, C) with row index (kh*3+kw)*CO + co, bf16, resident
    w_t = jnp.transpose(weight_oihw.astype(jnp.float32), (2, 3, 0, 1))
    w_t = w_t.reshape(ROWS, C)
    if Cp != C:
        w_t = jnp.pad(w_t, ((0, 0), (0, Cp - C)))
    w_t = w_t.astype(jnp.bfloat16)
    b_t = bias.astype(jnp.float32).reshape(CO, 1)

    # horizontal-boundary masks: row 0 valid for "left" taps, row 1 for "right"
    col = jnp.arange(W, dtype=jnp.int32)
    masks = jnp.stack([jnp.tile((col != 0).astype(jnp.float32), H),
                       jnp.tile((col != W - 1).astype(jnp.float32), H)])

    padl = _round_up(W + 1, 128)      # 128-aligned so per-step stores are aligned
    padr = W + 1
    kernel = _make_kernel(CO, H, W, TC, nc, padl, padr)

    flops = 2 * N * Cp * ROWS * HW + 30 * N * CO * HW
    bytes_accessed = (x_flat.size * 4 + w_t.size * 2 + masks.size * 4
                      + b_t.size * 4 + N * CO * HW * 4)
    cost = pl.CostEstimate(flops=int(flops), transcendentals=int(N * HW),
                           bytes_accessed=int(bytes_accessed))

    out = pl.pallas_call(
        kernel,
        out_shape=jax.ShapeDtypeStruct((N, CO, HW), jnp.float32),
        grid_spec=pltpu.PrefetchScalarGridSpec(
            num_scalar_prefetch=0,
            grid=(N, nc),
            in_specs=[
                pl.BlockSpec((1, TC, HW), lambda n, c: (n, c, 0)),
                pl.BlockSpec((ROWS, Cp), lambda n, c: (0, 0)),   # resident
                pl.BlockSpec((CO, 1), lambda n, c: (0, 0)),
                pl.BlockSpec((2, HW), lambda n, c: (0, 0)),
            ],
            out_specs=pl.BlockSpec((1, CO, HW), lambda n, c: (n, 0, 0)),
            scratch_shapes=[pltpu.VMEM((ROWS, padl + HW + padr), jnp.float32)],
        ),
        compiler_params=pltpu.CompilerParams(
            dimension_semantics=("parallel", "arbitrary"),
            vmem_limit_bytes=vmem_limit,
        ),
        cost_estimate=cost,
    )(x_flat, w_t, b_t, masks)

    # (N, CO, HW) -> NCHW; no crop needed (no fat layout anymore).
    return out.reshape(N, CO, H, W)


def _reference(x_nchw, weight_oihw, bias, operand_dtype=jnp.float32):
    """Plain-JAX reference matching the PyTorch forward (optionally with the
    matmul operands quantized to bf16 like the kernel)."""
    xq = x_nchw.astype(operand_dtype).astype(jnp.float32)
    wq = weight_oihw.astype(operand_dtype).astype(jnp.float32)
    y = lax.conv_general_dilated(
        xq, wq, window_strides=(1, 1), padding=((1, 1), (1, 1)),
        dimension_numbers=("NCHW", "OIHW", "NCHW"),
        precision=lax.Precision.HIGHEST)
    y = y + bias.astype(jnp.float32).reshape(1, -1, 1, 1)
    norm = jnp.sqrt(jnp.sum(y * y, axis=1, keepdims=True))
    return y / jnp.maximum(norm, 1e-12)


if __name__ == "__main__":
    # Small shapes consistent with the module (input_dim shrunk for the test).
    N, C, H, W = 2, 8, 16, 16
    CO = 3

    key = jax.random.PRNGKey(0)
    kx, kw, kb = jax.random.split(key, 3)

    x = jax.random.normal(kx, (N, C, H, W), dtype=jnp.float32)

    # Deterministic Conv2d-style init: uniform(-1/sqrt(fan_in), 1/sqrt(fan_in))
    fan_in = C * 3 * 3
    bound = 1.0 / (fan_in ** 0.5)
    weight = jax.random.uniform(kw, (CO, C, 3, 3), jnp.float32, -bound, bound)
    bias = jax.random.uniform(kb, (CO,), jnp.float32, -bound, bound)

    out = jax.block_until_ready(normal_head_pallas(x, weight, bias))
    assert out.shape == (N, CO, H, W)

    # Exact-structure check against a reference with the same bf16 operands.
    ref_q = _reference(x, weight, bias, operand_dtype=jnp.bfloat16)
    assert jnp.allclose(out, ref_q, atol=5e-4, rtol=5e-4), (
        "max err vs bf16-operand reference: "
        f"{float(jnp.max(jnp.abs(out - ref_q)))}")

    # Loose sanity check against the full-f32 PyTorch-equivalent reference
    # (bf16 matmul operands => relaxed tolerance, per perf review).
    ref_f = _reference(x, weight, bias, operand_dtype=jnp.float32)
    assert float(jnp.mean(jnp.abs(out - ref_f))) < 5e-2

    print("KERNEL_OK")
</pallas_src>

<mosaic_0001>
module attributes {stable_mosaic.version = 11 : i64} {
  func.func @kernel(%arg0: i32, %arg1: i32, %arg2: memref<1x8x256xf32, #tpu.memory_space<vmem>>, %arg3: memref<27x8xbf16, #tpu.memory_space<vmem>>, %arg4: memref<3x1xf32, #tpu.memory_space<vmem>>, %arg5: memref<2x256xf32, #tpu.memory_space<vmem>>, %arg6: memref<1x3x256xf32, #tpu.memory_space<vmem>>, %arg7: memref<27x401xf32, #tpu.memory_space<vmem>>) attributes {dimension_semantics = [#tpu.dimension_semantics<parallel>, #tpu.dimension_semantics<arbitrary>], iteration_bounds = array<i64: 2, 1>, scalar_prefetch = 0 : i64, scratch_operands = 1 : i64, tpu.core_type = #tpu.core_type<tc>, window_params = [{transform_indices = @transform_0, window_bounds = array<i64: 1, 8, 256>}, {pipeline_mode = #tpu.pipeline_mode<synchronous>, transform_indices = @transform_1, window_bounds = array<i64: 27, 8>}, {pipeline_mode = #tpu.pipeline_mode<synchronous>, transform_indices = @transform_2, window_bounds = array<i64: 3, 1>}, {pipeline_mode = #tpu.pipeline_mode<synchronous>, transform_indices = @transform_3, window_bounds = array<i64: 2, 256>}, {transform_indices = @transform_4, window_bounds = array<i64: 1, 3, 256>}]} {
    %c0 = arith.constant 0 : index
    %c0_0 = arith.constant 0 : index
    %c0_1 = arith.constant 0 : index
    %0 = vector.load %arg2[%c0, %c0_0, %c0_1] : memref<1x8x256xf32, #tpu.memory_space<vmem>>, vector<1x8x256xf32>
    %1 = vector.shape_cast %0 : vector<1x8x256xf32> to vector<8x256xf32>
    %2 = arith.truncf %1 : vector<8x256xf32> to vector<8x256xbf16>
    %c0_2 = arith.constant 0 : index
    %c0_3 = arith.constant 0 : index
    %3 = vector.load %arg3[%c0_2, %c0_3] : memref<27x8xbf16, #tpu.memory_space<vmem>>, vector<27x8xbf16>
    %cst = arith.constant dense<0.000000e+00> : vector<27x256xf32>
    %4 = tpu.matmul %3, %2, %cst {dimension_numbers = #tpu.dot_dimension_numbers<[1], [0], [0], [1], [0, 0, 1, 1], [], []>} : vector<27x8xbf16>, vector<8x256xbf16>, vector<27x256xf32> -> vector<27x256xf32>
    %c0_i32 = arith.constant 0 : i32
    %5 = arith.cmpi eq, %arg1, %c0_i32 : i32
    %6 = arith.extui %5 : i1 to i32
    %c0_i32_4 = arith.constant 0 : i32
    %7 = arith.cmpi ne, %6, %c0_i32_4 : i32
    scf.if %7 {
      %cst_9 = arith.constant 0.000000e+00 : f32
      %14 = vector.broadcast %cst_9 : f32 to vector<27x128xf32>
      %c0_10 = arith.constant 0 : index
      %c0_11 = arith.constant 0 : index
      %15 = vector.load %arg7[%c0_10, %c0_11] : memref<27x401xf32, #tpu.memory_space<vmem>>, vector<27x128xf32>
      tpu.vector_store %arg7[%c0_10, %c0_11], %14 {strides = array<i32>} : memref<27x401xf32, #tpu.memory_space<vmem>>, vector<27x128xf32>,
      %cst_12 = arith.constant 0.000000e+00 : f32
      %16 = vector.broadcast %cst_12 : f32 to vector<27x17xf32>
      %c0_13 = arith.constant 0 : index
      %c384 = arith.constant 384 : index
      %17 = vector.load %arg7[%c0_13, %c384] : memref<27x401xf32, #tpu.memory_space<vmem>>, vector<27x17xf32>
      tpu.vector_store %arg7[%c0_13, %c384], %16 {strides = array<i32>} : memref<27x401xf32, #tpu.memory_space<vmem>>, vector<27x17xf32>,
      %c0_14 = arith.constant 0 : index
      %c128 = arith.constant 128 : index
      %18 = vector.load %arg7[%c0_14, %c128] : memref<27x401xf32, #tpu.memory_space<vmem>>, vector<27x256xf32>
      tpu.vector_store %arg7[%c0_14, %c128], %4 {strides = array<i32>} : memref<27x401xf32, #tpu.memory_space<vmem>>, vector<27x256xf32>,
    } else {
    }
    %c0_i32_5 = arith.constant 0 : i32
    %8 = arith.cmpi sgt, %arg1, %c0_i32_5 : i32
    %9 = arith.extui %8 : i1 to i32
    %c0_i32_6 = arith.constant 0 : i32
    %10 = arith.cmpi ne, %9, %c0_i32_6 : i32
    scf.if %10 {
      %c0_9 = arith.constant 0 : index
      %c128 = arith.constant 128 : index
      %14 = vector.load %arg7[%c0_9, %c128] : memref<27x401xf32, #tpu.memory_space<vmem>>, vector<27x256xf32>
      %15 = arith.addf %14, %4 : vector<27x256xf32>
      %c0_10 = arith.constant 0 : index
      %c128_11 = arith.constant 128 : index
      %16 = vector.load %arg7[%c0_10, %c128_11] : memref<27x401xf32, #tpu.memory_space<vmem>>, vector<27x256xf32>
      tpu.vector_store %arg7[%c0_10, %c128_11], %15 {strides = array<i32>} : memref<27x401xf32, #tpu.memory_space<vmem>>, vector<27x256xf32>,
    } else {
    }
    %c0_i32_7 = arith.constant 0 : i32
    %11 = arith.cmpi eq, %arg1, %c0_i32_7 : i32
    %12 = arith.extui %11 : i1 to i32
    %c0_i32_8 = arith.constant 0 : i32
    %13 = arith.cmpi ne, %12, %c0_i32_8 : i32
    scf.if %13 {
      %cst_9 = arith.constant 0.000000e+00 : f32
      %14 = vector.broadcast %cst_9 : f32 to vector<3x256xf32>
      %c0_10 = arith.constant 0 : index
      %c111 = arith.constant 111 : index
      %15 = vector.load %arg7[%c0_10, %c111] : memref<27x401xf32, #tpu.memory_space<vmem>>, vector<3x256xf32>
      %c0_11 = arith.constant 0 : index
      %c0_12 = arith.constant 0 : index
      %16 = vector.load %arg5[%c0_11, %c0_12] : memref<2x256xf32, #tpu.memory_space<vmem>>, vector<1x256xf32>
      %17 = vector.broadcast %16 : vector<1x256xf32> to vector<3x256xf32>
      %18 = arith.mulf %15, %17 : vector<3x256xf32>
      %19 = arith.addf %14, %18 : vector<3x256xf32>
      %c3 = arith.constant 3 : index
      %c112 = arith.constant 112 : index
      %20 = vector.load %arg7[%c3, %c112] : memref<27x401xf32, #tpu.memory_space<vmem>>, vector<3x256xf32>
      %21 = arith.addf %19, %20 : vector<3x256xf32>
      %c6 = arith.constant 6 : index
      %c113 = arith.constant 113 : index
      %22 = vector.load %arg7[%c6, %c113] : memref<27x401xf32, #tpu.memory_space<vmem>>, vector<3x256xf32>
      %c1 = arith.constant 1 : index
      %c0_13 = arith.constant 0 : index
      %23 = vector.load %arg5[%c1, %c0_13] : memref<2x256xf32, #tpu.memory_space<vmem>>, vector<1x256xf32>
      %24 = vector.broadcast %23 : vector<1x256xf32> to vector<3x256xf32>
      %25 = arith.mulf %22, %24 : vector<3x256xf32>
      %26 = arith.addf %21, %25 : vector<3x256xf32>
      %c9 = arith.constant 9 : index
      %c127 = arith.constant 127 : index
      %27 = vector.load %arg7[%c9, %c127] : memref<27x401xf32, #tpu.memory_space<vmem>>, vector<3x256xf32>
      %c0_14 = arith.constant 0 : index
      %c0_15 = arith.constant 0 : index
      %28 = vector.load %arg5[%c0_14, %c0_15] : memref<2x256xf32, #tpu.memory_space<vmem>>, vector<1x256xf32>
      %29 = vector.broadcast %28 : vector<1x256xf32> to vector<3x256xf32>
      %30 = arith.mulf %27, %29 : vector<3x256xf32>
      %31 = arith.addf %26, %30 : vector<3x256xf32>
      %c12 = arith.constant 12 : index
      %c128 = arith.constant 128 : index
      %32 = vector.load %arg7[%c12, %c128] : memref<27x401xf32, #tpu.memory_space<vmem>>, vector<3x256xf32>
      %33 = arith.addf %31, %32 : vector<3x256xf32>
      %c15 = arith.constant 15 : index
      %c129 = arith.constant 129 : index
      %34 = vector.load %arg7[%c15, %c129] : memref<27x401xf32, #tpu.memory_space<vmem>>, vector<3x256xf32>
      %c1_16 = arith.constant 1 : index
      %c0_17 = arith.constant 0 : index
      %35 = vector.load %arg5[%c1_16, %c0_17] : memref<2x256xf32, #tpu.memory_space<vmem>>, vector<1x256xf32>
      %36 = vector.broadcast %35 : vector<1x256xf32> to vector<3x256xf32>
      %37 = arith.mulf %34, %36 : vector<3x256xf32>
      %38 = arith.addf %33, %37 : vector<3x256xf32>
      %c18 = arith.constant 18 : index
      %c143 = arith.constant 143 : index
      %39 = vector.load %arg7[%c18, %c143] : memref<27x401xf32, #tpu.memory_space<vmem>>, vector<3x256xf32>
      %c0_18 = arith.constant 0 : index
      %c0_19 = arith.constant 0 : index
      %40 = vector.load %arg5[%c0_18, %c0_19] : memref<2x256xf32, #tpu.memory_space<vmem>>, vector<1x256xf32>
      %41 = vector.broadcast %40 : vector<1x256xf32> to vector<3x256xf32>
      %42 = arith.mulf %39, %41 : vector<3x256xf32>
      %43 = arith.addf %38, %42 : vector<3x256xf32>
      %c21 = arith.constant 21 : index
      %c144 = arith.constant 144 : index
      %44 = vector.load %arg7[%c21, %c144] : memref<27x401xf32, #tpu.memory_space<vmem>>, vector<3x256xf32>
      %45 = arith.addf %43, %44 : vector<3x256xf32>
      %c24 = arith.constant 24 : index
      %c145 = arith.constant 145 : index
      %46 = vector.load %arg7[%c24, %c145] : memref<27x401xf32, #tpu.memory_space<vmem>>, vector<3x256xf32>
      %c1_20 = arith.constant 1 : index
      %c0_21 = arith.constant 0 : index
      %47 = vector.load %arg5[%c1_20, %c0_21] : memref<2x256xf32, #tpu.memory_space<vmem>>, vector<1x256xf32>
      %48 = vector.broadcast %47 : vector<1x256xf32> to vector<3x256xf32>
      %49 = arith.mulf %46, %48 : vector<3x256xf32>
      %50 = arith.addf %45, %49 : vector<3x256xf32>
      %c0_22 = arith.constant 0 : index
      %c0_23 = arith.constant 0 : index
      %51 = vector.load %arg4[%c0_22, %c0_23] : memref<3x1xf32, #tpu.memory_space<vmem>>, vector<3x1xf32>
      %52 = vector.broadcast %51 : vector<3x1xf32> to vector<3x256xf32>
      %53 = arith.addf %50, %52 : vector<3x256xf32>
      %54 = arith.mulf %53, %53 : vector<3x256xf32>
      %cst_24 = arith.constant dense<0.000000e+00> : vector<256xf32>
      %55 = vector.multi_reduction <add>, %54, %cst_24 [0] : vector<3x256xf32> to vector<256xf32>
      %56 = vector.shape_cast %55 : vector<256xf32> to vector<1x256xf32>
      %cst_25 = arith.constant 1.000000e-24 : f32
      %57 = vector.broadcast %cst_25 : f32 to vector<1x256xf32>
      %58 = arith.maximumf %56, %57 : vector<1x256xf32>
      %59 = math.rsqrt %58 : vector<1x256xf32>
      %60 = vector.broadcast %59 : vector<1x256xf32> to vector<3x256xf32>
      %61 = arith.mulf %53, %60 : vector<3x256xf32>
      %c0_26 = arith.constant 0 : index
      %c0_27 = arith.constant 0 : index
      %c0_28 = arith.constant 0 : index
      %62 = vector.load %arg6[%c0_26, %c0_27, %c0_28] : memref<1x3x256xf32, #tpu.memory_space<vmem>>, vector<1x3x256xf32>
      %63 = vector.shape_cast %62 : vector<1x3x256xf32> to vector<3x256xf32>
      %64 = vector.shape_cast %61 : vector<3x256xf32> to vector<1x3x256xf32>
      tpu.vector_store %arg6[%c0_26, %c0_27, %c0_28], %64 {strides = array<i32>} : memref<1x3x256xf32, #tpu.memory_space<vmem>>, vector<1x3x256xf32>,
    } else {
    }
    return
  }
  func.func @transform_0(%arg0: i32, %arg1: i32) -> (i32, i32, i32) {
    %c0_i32 = arith.constant 0 : i32
    %c0_i32_0 = arith.constant 0 : i32
    return %arg0, %arg1, %c0_i32 : i32, i32, i32
  }
  func.func @transform_1(%arg0: i32, %arg1: i32) -> (i32, i32) {
    %c0_i32 = arith.constant 0 : i32
    %c0_i32_0 = arith.constant 0 : i32
    %c0_i32_1 = arith.constant 0 : i32
    return %c0_i32, %c0_i32_0 : i32, i32
  }
  func.func @transform_2(%arg0: i32, %arg1: i32) -> (i32, i32) {
    %c0_i32 = arith.constant 0 : i32
    %c0_i32_0 = arith.constant 0 : i32
    %c0_i32_1 = arith.constant 0 : i32
    return %c0_i32, %c0_i32_0 : i32, i32
  }
  func.func @transform_3(%arg0: i32, %arg1: i32) -> (i32, i32) {
    %c0_i32 = arith.constant 0 : i32
    %c0_i32_0 = arith.constant 0 : i32
    %c0_i32_1 = arith.constant 0 : i32
    return %c0_i32, %c0_i32_0 : i32, i32
  }
  func.func @transform_4(%arg0: i32, %arg1: i32) -> (i32, i32, i32) {
    %c0_i32 = arith.constant 0 : i32
    %c0_i32_0 = arith.constant 0 : i32
    %c0_i32_1 = arith.constant 0 : i32
    return %arg0, %c0_i32, %c0_i32_0 : i32, i32, i32
  }
}

</mosaic_0001>

<bundles_post_ra>
// kernel: tpu_custom_call.1
= control target key start
LH: loop header
LB: loop body
LE: loop exit
PB: predicated region body
PF: predicated region fallthrough
CT: control target
= control target key end

     0   :  { %9 = vsyncpa [#allocation4], 0  ;;  %s1264_s0 = inlined_call_operand.hbm [shape: f32[2,8,256], index: 0, kind: input, shape index: {}]   ;;  %s1265_s1 = inlined_call_operand.vmem [shape: bf16[27,8], index: 1, kind: input, shape index: {}]   ;;  %s1266_s2 = inlined_call_operand.vmem [shape: f32[3,1], index: 2, kind: input, shape index: {}]   ;;  %s1267_s3 = inlined_call_operand.vmem [shape: f32[2,256], index: 3, kind: input, shape index: {}]   ;;  %s1268_s4 = inlined_call_operand.vmem [shape: f32[2,3,256], index: 4, kind: output, shape index: {}]  }
   0x1   :  { %11 = vsyncpa [#allocation4 + $0x1], 0  ;;  %s1043_s15 = smov 0   ;;  %s1045_s16 = smov 0  }
   0x2   :  { %s1047_s17 = smov 0   ;;  %s1049_s18 = smov 0  }
   0x3   :  { %s1051_s19 = smov 0   ;;  %s1053_s20 = smov 0  }
   0x4 LB: > { %s820_s21 = sadd.s32 4294967295, %s1001_s20   ;;  %s29_s22 = sadd.s32 1, %s997_s19  ;;  %s1001_s20 = sphi %s1053_s20, %s17_s20   ;;  %s997_s19 = sphi %s1051_s19, %s1278_s19   ;;  %s993_s18 = sphi %s1049_s18, %s1277_s18   ;;  %s989_s17 = sphi %s1047_s17, %s1276_s17   ;;  %s985_s16 = sphi %s1045_s16, %s1275_s16   ;;  %s981_s15 = sphi %s1043_s15, %s1274_s15  }
   0x5   : > { %p31_p0 = scmp.ge.s32.totalorder %s29_s22, 2  ;;  %s38_s23 = sadd.s32 1, %s989_s17 }
   0x6   : > { %p45_p1 = scmp.ne.s32.totalorder %s989_s17, %s985_s16  ;;  %p46_p2 = scmp.eq.s32.totalorder %s1001_s20, 0 }
   0x7   : > { %s1280_s22 = smov (%p31_p0, %s29_s22), 0  ;;  %p51_p4 = scmp.ne.s32.totalorder %s985_s16, %s981_s15 }
   0x8   : > { %p1079_p3 = por %p46_p2, %p45_p1  ;;  %s33_s25 = ssub.s32 %s997_s19, %s1280_s22 }
   0x9   : > { %p52_p5 = scmp.eq.s32.totalorder %s820_s21, 0  ;;  %p36_p6 = scmp.eq.s32.totalorder %s33_s25, 0 }
   0xa   : > { %p849_p8 = scmp.lt.s32.totalorder %s1001_s20, 2  ;;  %s173_s28 = sand.u32 1, %s989_s17  }
   0xb   : > { %p1086_p7 = por %p52_p5, %p51_p4  ;;  %s839_s29 = sshll.u32 %s997_s19, 8 }
   0xc   : > { %s1092_s27 = scalar_select %p36_p6, %s989_s17, %s38_s23  }
   0xd   : > { %s824_s30 = sshll.u32 %s173_s28, 4  ;;  %s1099_s7 = scalar_lea.hbm %s1264_s0, %s839_s29 }
   0xe   : > { %s177_s8 = scalar_lea.vmem [#allocation3], %s824_s30  ;;  %p1103_p9 = pnand %p849_p8, %p1079_p3 }
   0xf   : > { %s187_s9 = sshll.u32 %s177_s8, 4  ;;  %s174_s11 = scalar_lea.sflag [#allocation4], %s173_s28  ;;  %s1107_s9 = int_to_ptr.vmem [resolvable:$true] %s187_s9 }
  0x10   : > { %s921_s12 = scalar_lea.hbm %s1099_s7, 256  ;;  %p923_p13 = pneg %p1103_p9 }
  0x11   : > { %p922_p12 = scmp.ne.s32.totalorder %s1099_s7, %s921_s12  ;;  %s926_s15 = scalar_lea.hbm %s1264_s0, 512 }
  0x12   : > { %p927_p2 = scmp.lt.u32.totalorder %s1099_s7, %s1264_s0  ;;  %p928_p3 = scmp.lt.u32.totalorder %s926_s15, %s921_s12 }
  0x13   : > { %p924_p0 = pnand %p923_p13, %p922_p12  ;;  %p930_p5 = scmp.lt.u32.totalorder %s921_s12, %s1099_s7 }
  0x14   : > { %p929_p4 = por %p928_p3, %p927_p2 }
  0x15   : > { %p925_p1 = pneg %p924_p0 }
  0x16   : > { %p931_p6 = por %p930_p5, %p929_p4 }
  0x18   : > { %p932_p8 = pnand %p931_p6, %p925_p1 }
  0x1a   : > { %935 = shalt.err (!%p932_p8)
}
  0x1b   : > { %s936_s24 = scalar_lea.vmem %s1107_s9, 256  ;;  %s1003_s25 = smov [#allocation3]  }
  0x1c   : > { %p937_p12 = scmp.ne.s32.totalorder %s1107_s9, %s936_s24  ;;  %s941_s28 = sshll.u32 %s1003_s25, 4  ;;  %s942_s28 = int_to_ptr.vmem [resolvable:$false] %s941_s28 }
  0x1d   : > { %s943_s29 = scalar_lea.vmem %s942_s28, 512  ;;  %p944_p11 = scmp.lt.s32.totalorder %s1107_s9, %s942_s28 }
  0x1e   : > { %p939_p0 = pnand %p937_p12, %p923_p13  ;;  %p945_p2 = scmp.lt.s32.totalorder %s943_s29, %s936_s24 }
  0x20   : > { %p940_p10 = pneg %p939_p0  ;;  %p946_p3 = por %p945_p2, %p944_p11 }
  0x22   : > { %p947_p4 = pnand %p946_p3, %p940_p10 }
  0x24   : > { %950 = shalt.err (!%p947_p4)
}
  0x25   : > { %848 = dma.hbm_to_vmem [thread:$0]  (!%p1103_p9), %s1099_s7, 256, %s1107_s9, %s174_s11  }
  0x26   : > { %p1272_p1 = scmp.lt.s32.totalorder %s1001_s20, 3  ;;  %p1273_p5 = scmp.ge.s32.totalorder %s1001_s20, 1 }
  0x28   : > { %p193_p13 = pnand %p1273_p5, %p1272_p1 }
  0x29   : > { %s198_s30 = sand.u32 (!%p193_p13), 1, %s985_s16  }
  0x2a   : > { %196 = sbr.rel (%p193_p13) target bundleno = 583 (0x247), region = 36  ;;  %s828_s5 = sshll.u32 (!%p193_p13), %s198_s30, 4 }
  0x2b   : > { %s199_s6 = scalar_lea.sflag (!%p193_p13), [#allocation4], %s198_s30  ;;  %s202_s8 = scalar_lea.vmem (!%p193_p13), [#allocation3], %s828_s5 }
  0x31   : > { %976 = dma.done.wait (%p1086_p7), %s199_s6, 256  }
  0x32   : > { %978 = vsyncadd (%p1086_p7), %s199_s6, 4294967040  ;;  %v376_v0 = vlaneseq  ;;  %v1004_v1 = vmov 0   ;;  %v1005_v2 = vmov 0.0   ;;  %vm326_vm0 = vcmask 138240   ;;  %v234_v4 = vld [vmem:[%s202_s8 + $0x8] sm:$0xff]  ;;  %v233_v5 = vld [vmem:[%s202_s8] sm:$0xff] }
  0x33   : > { %297 = vmatprep.mubr.bf16.mxu0 %v1004_v1  ;;  %307 = vmatprep.mubr.bf16.mxu1 %v1004_v1  ;;  %322 = vst [vmem:[#allocation2] sm:$0xff] %v1005_v2  ;;  %323 = vst [vmem:[#allocation2 + $0x20] sm:$0xff] %v1005_v2  ;;  %vm258_vm1 = vcmask 1043456   ;;  %v236_v7 = vpack.c.bf16 %v234_v4, %v234_v4  ;;  %v235_v8 = vpack.c.bf16 %v233_v5, %v233_v5  ;;  %v913_v9 = vld [vmem:[%s1265_s1] sm:$0xff]   ;;  %v914_v12 = vld [vmem:[%s1265_s1 + $0x8] sm:$0x3f]  }
  0x34   : > { %912 = vset.pattern.permute.xlu0 %v1004_v1  ;;  %v377_v3 = vshrl.u32 %v376_v0, 7  ;;  %328 = vst.msk [vmem:[#allocation2 + $0x38] sm:$0xff] %vm326_vm0, %v1005_v2  ;;  %329 = vst.msk [vmem:[#allocation2 + $0x58] sm:$0xff] %vm326_vm0, %v1005_v2  ;;  %v374_v13 = vld [vmem:[%s1267_s3] ss:$2 sm:$0x3] }
  0x35   : > { %833 = vmatprep.subr.msk.bf16.mxu0 %vm258_vm1, %v236_v7  ;;  %841 = vmatprep.subr.msk.bf16.mxu1 %vm258_vm1, %v236_v7  ;;  %v260_v11 = vsel %vm258_vm1, %v235_v8, 0  ;;  %vm251_vm2 = vcmask 64512   ;;  %v836_v15 = vld [vmem:[%s1267_s3 + $0x1] ss:$2 sm:$0x3]  ;;  %s1006_s15 = smov 127  }
  0x36   : > { %v378_v6 = vsub.s32 0, %v377_v3  ;;  %v382_v10 = vsub.s32 1, %v377_v3  ;;  %266 = vmatpush1.bf16.msra.mxu0 %v260_v11  ;;  %842 = vmatpush1.bf16.msra.mxu1 %v260_v11  ;;  %s1007_s21 = smov 113   ;;  %s1008_s23 = smov 1   ;;  %v683_v21 = vld [vmem:[%s1266_s2] sm:$0x7] }
  0x37   : > { %s1009_s24 = smov 15   ;;  %s1010_s25 = smov 17   ;;  %vm330_vm3 = vcmask 133120   ;;  %vm461_vm4 = vcmask 1041408   ;;  %vm565_vm5 = vcmask 1040384   ;;  %vm597_vm6 = vcmask 121856  }
  0x38   : > { %v379_v14 = vrot.slane %v374_v13, %v378_v6  ;;  %v435_v16 = vrot.slane %v836_v15, %v378_v6  ;;  %v383_v17 = vrot.slane %v374_v13, %v382_v10  ;;  %v439_v18 = vrot.slane %v836_v15, %v382_v10  ;;  %s1011_s28 = smov 111   ;;  %331 = vst.msk [vmem:[#allocation2 + $0x78] sm:$0x7] %vm330_vm3, %v1005_v2  ;;  %s1012_s5 = smov 112  }
  0x39   : > { %834 = vmatmul.mubr.msk.bf16.vlgmr.msra.gmra.mrb[0].mxu0 %vm251_vm2, %v913_v9  ;;  %835 = vmatmul.mubr.msk.bf16.vlgmr.msra.gmra.mrb[0].mxu1 %vm251_vm2, %v914_v12  ;;  %s1013_s6 = smov 96   ;;  %s1014_s8 = smov 126   ;;  %vm444_vm7 = vcmask 924672   ;;  %vm414_vm8 = vcmask 1039360   ;;  %vm548_vm9 = vcmask 7168   ;;  %vm477_vm10 = vcmask 1031168  }
  0x3a   : > { %489 = vrot.lane.b32.xlu1 %v379_v14, %s1006_s15  ;;  %440 = vrot.lane.b32.xlu0 %v435_v16, %s1007_s21  ;;  %v399_v19 = vld [vmem:[#allocation2] sm:$0x38]  ;;  %v423_v27 = vld [vmem:[#allocation2] sm:$0xc0]  ;;  %v426_v28 = vld [vmem:[#allocation2 + $0x20] sm:$0x1] }
  0x3b   : > { %v405_v20 = vrot.slane %v399_v19, 3  ;;  %v486_v22 = vld [vmem:[#allocation2 + $0x20] sm:$0xe]  ;;  %v592_v33 = vld [vmem:[#allocation2 + $0x58] sm:$0x1c]  ;;  %s1015_s26 = smov 110  }
  0x3c   : > { %v540_v34 = vld [vmem:[#allocation2 + $0x38] sm:$0x80]  ;;  %v543_v35 = vld [vmem:[#allocation2 + $0x58] sm:$0x3]  ;;  %s1016_s7 = smov 95   ;;  %s1017_s9 = smov 94  }
  0x3d   : > { %vm388_vm11 = vcmask 908288   ;;  %vm512_vm12 = vcmask 916480   ;;  %vm581_vm13 = vcmask 900096   ;;  %vm617_vm14 = vcmask 785408   ;;  %p227_p7 = scmp.lt.s32.totalorder %s993_s18, 1 }
  0x3e   : > { %491 = vrot.lane.b32.xlu1 %v383_v17, %s1006_s15  ;;  %442 = vrot.lane.b32.xlu0 %v439_v18, %s1007_s21  ;;  %vm641_vm15 = vcmask 777216   ;;  %vm674_vm2 = vcmask 769024   ;;  %vm695_vm3 = vcmask 1043320  }
  0x3f   : > { %s1282_s18 = smov (!%p227_p7, %s993_s18), 1 }
  0x40   : > { %s840_s10 = sshll.u32 %s1282_s18, 3 }
  0x41   : > { %s231_s13 = scalar_lea.vmem %s1268_s4, %s840_s10 }
  0x42   : > { %546 = vrot.lane.b32.xlu1 %v439_v18, %s1008_s23  ;;  %544 = vrot.lane.b32.xlu0 %v435_v16, %s1008_s23 }
  0x46   : > { %595 = vrot.lane.b32.xlu1 %v383_v17, %s1009_s24  ;;  %593 = vrot.lane.b32.xlu0 %v379_v14, %s1009_s24 }
  0x4a   : > { %655 = vrot.lane.b32.xlu1 %v439_v18, %s1010_s25  ;;  %653 = vrot.lane.b32.xlu0 %v435_v16, %s1010_s25 }
  0x4e   : > { %386 = vrot.lane.b32.xlu1 %v383_v17, %s1011_s28  ;;  %384 = vrot.lane.b32.xlu0 %v379_v14, %s1011_s28 }
  0x52   : > { %408 = vrot.lane.b32.xlu0 %v405_v20, %s1006_s15 }
  0x56   : > { %686 = vperm.xlu0 %912, %v683_v21  }
  0xac   : > { %v1172_v23 = vpop.permute.xlu1 %489  ;;  %v1180_v30 = vpop.permute.xlu0 %440 }
  0xad   : > { %v497_v24 = vmul.f32 %v1172_v23, %v486_v22  ;;  %v449_v31 = vmul.f32 %v1180_v30, %v423_v27  ;;  %v452_v32 = vmul.f32 %v1180_v30, %v426_v28 }
  0xaf   : > { %v503_v25 = vrot.slane %v497_v24, 1  ;;  %v462_v40 = vrot.slane %v449_v31, 6  ;;  %v463_v41 = vrot.slane %v452_v32, 6 }
  0xb0   : > { %v1175_v26 = vpop.permute.xlu1 %491  ;;  %v1191_v47 = vpop.permute.xlu0 %442 }
  0xb1   : > { %506 = vrot.lane.b32.xlu0 %v503_v25, %s1012_s5  ;;  %v464_v45 = vsel %vm461_vm4, %v462_v40, %v463_v41  ;;  %v445_v7 = vsel %vm444_vm7, %v1180_v30, %v1191_v47  ;;  %v493_v13 = vsel %vm414_vm8, %v1172_v23, %v1175_v26 }
  0xb4   : > { %v1178_v29 = vpop.permute.xlu1 %546  ;;  %v1193_v48 = vpop.permute.xlu0 %544 }
  0xb5   : > { %v555_v38 = vmul.f32 %v1178_v29, %v540_v34  ;;  %v558_v39 = vmul.f32 %v1178_v29, %v543_v35 }
  0xb7   : > { %v572_v43 = vrot.slane %v555_v38, 7  ;;  %v573_v44 = vrot.slane %v558_v39, 7 }
  0xb8   : > { %v596_v36 = vpop.permute.xlu1 %595  ;;  %v594_v57 = vpop.permute.xlu0 %593 }
  0xb9   : > { %v604_v37 = vmul.f32 %v596_v36, %v592_v33  ;;  %v574_v46 = vsel %vm565_vm5, %v572_v43, %v573_v44  ;;  %v598_v2 = vsel %vm597_vm6, %v594_v57, %v596_v36  ;;  %v549_v36 = vsel %vm548_vm9, %v1193_v48, %v1178_v29 }
  0xbb   : > { %v610_v42 = vrot.slane %v604_v37, 2 }
  0xbd   : > { %615 = vrot.lane.b32.xlu1 %v610_v42, %s1013_s6 }
  0xc1   : > { %471 = vrot.lane.b32.xlu1 %v464_v45, %s1014_s8 }
  0xc5   : > { %579 = vrot.lane.b32.xlu1 %v574_v46, %s1015_s26 }
 0x10c   : > { %v299_v49 = vpop.f32.mrb[0].mxu0  ;;  %v309_v50 = vpop.f32.mrb[0].mxu1 }
 0x10d   : > { %332 = vst [vmem:[#allocation2 + $0x8] sm:$0xff] %v299_v49  ;;  %336 = vst [vmem:[#allocation2 + $0x48] sm:$0xff] %v309_v50  ;;  %v301_v51 = vpop.f32.mrb[1].mxu0  ;;  %v311_v52 = vpop.f32.mrb[1].mxu1 }
 0x10e   : > { %333 = vst [vmem:[#allocation2 + $0x10] sm:$0xff] %v301_v51  ;;  %337 = vst [vmem:[#allocation2 + $0x50] sm:$0xff] %v311_v52  ;;  %v303_v53 = vpop.f32.mrb[2].mxu0  ;;  %v313_v54 = vpop.f32.mrb[2].mxu1 }
 0x10f   : > { %334 = vst [vmem:[#allocation2 + $0x28] sm:$0xff] %v303_v53  ;;  %v305_v55 = vpop.f32.mrb[3].mxu0  ;;  %338 = vst [vmem:[#allocation2 + $0x68] sm:$0x7] %v313_v54  ;;  %v315_v56 = vpop.f32.mrb[3].mxu1 }
 0x110   : > { %335 = vst [vmem:[#allocation2 + $0x30] sm:$0xff] %v305_v55  ;;  %339 = vst [vmem:[#allocation2 + $0x70] sm:$0x7] %v315_v56  ;;  %v654_v53 = vpop.permute.xlu0 %653  ;;  %v656_v54 = vpop.permute.xlu1 %655 }
 0x111   : > { %v658_v55 = vsel %vm326_vm0, %v654_v53, %v656_v54 }
 0x114   : > { %v400_v58 = vld [vmem:[#allocation2 + $0x8] sm:$0x38]  ;;  %v424_v9 = vld [vmem:[#allocation2 + $0x8] sm:$0xc0]  ;;  %v541_v17 = vld [vmem:[#allocation2 + $0x48] sm:$0x3] }
 0x115   : > { %v590_v59 = vld [vmem:[#allocation2 + $0x48] sm:$0x1c]  ;;  %v406_v60 = vrot.slane %v400_v58, 3  ;;  %v401_v61 = vld [vmem:[#allocation2 + $0x10] sm:$0x38]  ;;  %v450_v16 = vmul.f32 %v445_v7, %v424_v9  ;;  %v556_v24 = vmul.f32 %v1193_v48, %v541_v17 }
 0x116   : > { %v602_v62 = vmul.f32 %v594_v57, %v590_v59  ;;  %v407_v63 = vrot.slane %v401_v61, 3  ;;  %v521_v0 = vld [vmem:[#allocation2 + $0x28] sm:$0x70]  ;;  %v591_v1 = vld [vmem:[#allocation2 + $0x50] sm:$0x1c]  ;;  %v387_v61 = vpop.permute.xlu1 %386 }
 0x117   : > { %410 = vrot.lane.b32.xlu1 %v406_v60, %s1006_s15  ;;  %v427_v4 = vld [vmem:[#allocation2 + $0x28] sm:$0x1]  ;;  %v525_v5 = vrot.slane %v521_v0, 4  ;;  %v603_v6 = vmul.f32 %v598_v2, %v591_v1  ;;  %v487_v8 = vld [vmem:[#allocation2 + $0x28] sm:$0xe]  ;;  %v465_v23 = vrot.slane %v450_v16, 6 }
 0x118   : > { %412 = vrot.lane.b32.xlu0 %v407_v63, %s1006_s15  ;;  %v608_v3 = vrot.slane %v602_v62, 2  ;;  %v522_v10 = vld [vmem:[#allocation2 + $0x30] sm:$0x70]  ;;  %v453_v11 = vmul.f32 %v445_v7, %v427_v4  ;;  %v538_v12 = vld [vmem:[#allocation2 + $0x28] sm:$0x80]  ;;  %v498_v15 = vmul.f32 %v493_v13, %v487_v8  ;;  %v567_v33 = vrot.slane %v556_v24, 7  ;;  %v385_v62 = vpop.permute.xlu0 %384 }
 0x119   : > { %v609_v14 = vrot.slane %v603_v6, 2  ;;  %v526_v18 = vrot.slane %v522_v10, 4  ;;  %v553_v19 = vmul.f32 %v1193_v48, %v538_v12  ;;  %v488_v21 = vld [vmem:[#allocation2 + $0x30] sm:$0xe]  ;;  %v428_v22 = vld [vmem:[#allocation2 + $0x30] sm:$0x1] }
 0x11a   : > { %v466_v20 = vrot.slane %v453_v11, 6  ;;  %v504_v25 = vrot.slane %v498_v15, 1  ;;  %v425_v27 = vld [vmem:[#allocation2 + $0x10] sm:$0xc0]  ;;  %v499_v30 = vmul.f32 %v1175_v26, %v488_v21  ;;  %v454_v31 = vmul.f32 %v1191_v47, %v428_v22  ;;  %v542_v39 = vld [vmem:[#allocation2 + $0x50] sm:$0x3] }
 0x11b   : > { %527 = vrot.lane.b32.xlu1 %v525_v5, %s1011_s28  ;;  %v566_v28 = vrot.slane %v553_v19, 7  ;;  %v451_v34 = vmul.f32 %v1191_v47, %v425_v27  ;;  %v539_v35 = vld [vmem:[#allocation2 + $0x30] sm:$0x80]  ;;  %v557_v43 = vmul.f32 %v549_v36, %v542_v39  ;;  %v626_v46 = vld [vmem:[#allocation2 + $0x48] sm:$0xe0] }
 0x11c   : > { %611 = vrot.lane.b32.xlu0 %v608_v3, %s1013_s6  ;;  %v467_v32 = vsel %vm461_vm4, %v465_v23, %v466_v20  ;;  %v505_v38 = vrot.slane %v499_v30, 1  ;;  %v469_v26 = vrot.slane %v454_v31, 6  ;;  %v627_v40 = vld [vmem:[#allocation2 + $0x50] sm:$0xe0]  ;;  %v554_v41 = vmul.f32 %v549_v36, %v539_v35  ;;  %v628_v47 = vld [vmem:[#allocation2 + $0x58] sm:$0xe0]  ;;  %v409_v0 = vpop.permute.xlu0 %408 }
 0x11d   : > { %v568_v37 = vsel %vm565_vm5, %v566_v28, %v567_v33  ;;  %v468_v42 = vrot.slane %v451_v34, 6  ;;  %v633_v45 = vrot.slane %v627_v40, 5  ;;  %v632_v48 = vrot.slane %v626_v46, 5  ;;  %v650_v52 = vld [vmem:[#allocation2 + $0x68] sm:$0x7] }
 0x11e   : > { %v569_v29 = vrot.slane %v554_v41, 7  ;;  %v570_v49 = vrot.slane %v557_v43, 7  ;;  %v634_v51 = vrot.slane %v628_v47, 5  ;;  %v662_v56 = vmul.f32 %v654_v53, %v650_v52  ;;  %v651_v57 = vld [vmem:[#allocation2 + $0x70] sm:$0x7] }
 0x11f   : > { %613 = vrot.lane.b32.xlu1 %v609_v14, %s1013_s6  ;;  %v470_v44 = vsel %vm461_vm4, %v468_v42, %v469_v26  ;;  %v652_v58 = vld [vmem:[#allocation2 + $0x78] sm:$0x7]  ;;  %v663_v59 = vmul.f32 %v658_v55, %v651_v57  ;;  %v371_v9 = vld [vmem:[#allocation2] sm:$0x7]  ;;  %v373_v17 = vld [vmem:[#allocation2 + $0x10] sm:$0x7]  ;;  %v389_v20 = vsel %vm388_vm11, %v385_v62, %v387_v61 }
 0x120   : > { %529 = vrot.lane.b32.xlu0 %v526_v18, %s1011_s28  ;;  %v571_v50 = vsel %vm565_vm5, %v569_v29, %v570_v49  ;;  %v664_v60 = vmul.f32 %v656_v54, %v652_v58  ;;  %v1224_v2 = vpop.permute.xlu0 %686  ;;  %v393_v13 = vmul.f32 %v385_v62, %v371_v9  ;;  %v372_v19 = vld [vmem:[#allocation2 + $0x8] sm:$0x7]  ;;  %vm703_vm4 = vcmask 1042432  }
 0x121   : > { %v394_v30 = vmul.f32 %v389_v20, %v372_v19  ;;  %vm711_vm5 = vcmask 903168  }
 0x123   : > { %508 = vrot.lane.b32.xlu1 %v504_v25, %s1012_s5  ;;  %v395_v25 = vmul.f32 %v387_v61, %v373_v17 }
 0x124   : > { %473 = vrot.lane.b32.xlu0 %v467_v32, %s1014_s8  ;;  %v507_v4 = vpop.permute.xlu0 %506 }
 0x127   : > { %575 = vrot.lane.b32.xlu1 %v568_v37, %s1015_s26 }
 0x128   : > { %510 = vrot.lane.b32.xlu0 %v505_v38, %s1012_s5 }
 0x12b   : > { %475 = vrot.lane.b32.xlu1 %v470_v44, %s1014_s8 }
 0x12c   : > { %637 = vrot.lane.b32.xlu0 %v633_v45, %s1016_s7 }
 0x12f   : > { %635 = vrot.lane.b32.xlu1 %v632_v48, %s1016_s7  ;;  %v616_v63 = vpop.permute.xlu1 %615 }
 0x130   : > { %577 = vrot.lane.b32.xlu0 %v571_v50, %s1015_s26 }
 0x133   : > { %639 = vrot.lane.b32.xlu1 %v634_v51, %s1016_s7  ;;  %v472_v1 = vpop.permute.xlu1 %471 }
 0x134   : > { %668 = vrot.lane.b32.xlu0 %v662_v56, %s1017_s9 }
 0x137   : > { %670 = vrot.lane.b32.xlu1 %v663_v59, %s1017_s9  ;;  %v580_v3 = vpop.permute.xlu1 %579 }
 0x138   : > { %672 = vrot.lane.b32.xlu0 %v664_v60, %s1017_s9 }
 0x189   : > { %v411_v5 = vpop.permute.xlu1 %410 }
 0x18a   : > { %v413_v6 = vpop.permute.xlu0 %412  ;;  %v415_v12 = vsel %vm414_vm8, %v409_v0, %v411_v5 }
 0x18b   : > { %v420_v15 = vadd.f32 %v415_v12, %v393_v13  ;;  %v416_v23 = vsel %vm414_vm8, %v411_v5, %v413_v6  ;;  %v422_v31 = vadd.f32 %v413_v6, %v395_v25 }
 0x18c   : > { %v421_v33 = vadd.f32 %v416_v23, %v394_v30 }
 0x18d   : > { %v528_v7 = vpop.permute.xlu1 %527 }
 0x18e   : > { %v612_v8 = vpop.permute.xlu0 %611 }
 0x191   : > { %v614_v10 = vpop.permute.xlu1 %613 }
 0x192   : > { %v530_v11 = vpop.permute.xlu0 %529  ;;  %v619_v50 = vsel %vm617_vm14, %v614_v10, %v616_v63  ;;  %v618_v54 = vsel %vm617_vm14, %v612_v8, %v614_v10 }
 0x193   : > { %v531_v44 = vsel %vm388_vm11, %v528_v7, %v530_v11 }
 0x195   : > { %v509_v14 = vpop.permute.xlu1 %508 }
 0x196   : > { %v474_v16 = vpop.permute.xlu0 %473  ;;  %v513_v22 = vsel %vm512_vm12, %v507_v4, %v509_v14 }
 0x197   : > { %v478_v18 = vsel %vm477_vm10, %v472_v1, %v474_v16 }
 0x198   : > { %v483_v21 = vadd.f32 %v478_v18, %v420_v15 }
 0x199   : > { %v576_v24 = vpop.permute.xlu1 %575 }
 0x19a   : > { %v518_v27 = vadd.f32 %v513_v22, %v483_v21  ;;  %v511_v28 = vpop.permute.xlu0 %510 }
 0x19b   : > { %v514_v39 = vsel %vm512_vm12, %v509_v14, %v511_v28 }
 0x19c   : > { %v535_v32 = vadd.f32 %v528_v7, %v518_v27 }
 0x19d   : > { %v476_v34 = vpop.permute.xlu1 %475 }
 0x19e   : > { %v587_v35 = vadd.f32 %v576_v24, %v535_v32  ;;  %v479_v36 = vsel %vm477_vm10, %v474_v16, %v476_v34  ;;  %v485_v37 = vadd.f32 %v476_v34, %v422_v31  ;;  %v638_v38 = vpop.permute.xlu0 %637 }
 0x19f   : > { %v484_v26 = vadd.f32 %v479_v36, %v421_v33 }
 0x1a0   : > { %v520_v40 = vadd.f32 %v511_v28, %v485_v37  ;;  %v623_v42 = vadd.f32 %v612_v8, %v587_v35 }
 0x1a1   : > { %v519_v41 = vadd.f32 %v514_v39, %v484_v26  ;;  %v636_v43 = vpop.permute.xlu1 %635 }
 0x1a2   : > { %v578_v45 = vpop.permute.xlu0 %577  ;;  %v537_v46 = vadd.f32 %v530_v11, %v520_v40  ;;  %v647_v51 = vadd.f32 %v636_v43, %v623_v42  ;;  %v642_v60 = vsel %vm641_vm15, %v636_v43, %v638_v38 }
 0x1a3   : > { %v536_v29 = vadd.f32 %v531_v44, %v519_v41  ;;  %v582_v47 = vsel %vm581_vm13, %v576_v24, %v578_v45  ;;  %v583_v48 = vsel %vm581_vm13, %v578_v45, %v580_v3 }
 0x1a4   : > { %v589_v49 = vadd.f32 %v583_v48, %v537_v46 }
 0x1a5   : > { %v588_v52 = vadd.f32 %v582_v47, %v536_v29  ;;  %v640_v53 = vpop.permute.xlu1 %639 }
 0x1a6   : > { %v625_v55 = vadd.f32 %v619_v50, %v589_v49  ;;  %v669_v56 = vpop.permute.xlu0 %668  ;;  %v643_v58 = vsel %vm641_vm15, %v638_v38, %v640_v53 }
 0x1a7   : > { %v624_v57 = vadd.f32 %v618_v54, %v588_v52  ;;  %v680_v59 = vadd.f32 %v669_v56, %v647_v51 }
 0x1a8   : > { %v649_v1 = vadd.f32 %v643_v58, %v625_v55 }
 0x1a9   : > { %v689_v61 = vadd.f32 %v1224_v2, %v680_v59  ;;  %v648_v62 = vadd.f32 %v642_v60, %v624_v57  ;;  %v671_v0 = vpop.permute.xlu1 %670 }
 0x1aa   : > { %v675_v3 = vsel %vm674_vm2, %v669_v56, %v671_v0  ;;  %v673_v63 = vpop.permute.xlu0 %672 }
 0x1ab   : > { %v692_v4 = vmul.f32 %v689_v61, %v689_v61  ;;  %v681_v5 = vadd.f32 %v675_v3, %v648_v62  ;;  %v676_v6 = vsel %vm674_vm2, %v671_v0, %v673_v63 }
 0x1ac   : > { %v682_v7 = vadd.f32 %v676_v6, %v649_v1 }
 0x1ad   : > { %v696_v8 = vsel %vm695_vm3, %v692_v4, 0.0  ;;  %v690_v9 = vadd.f32 %v1224_v2, %v681_v5 }
 0x1ae   : > { %v697_v10 = vrot.slane %v696_v8, 4  ;;  %v691_v11 = vadd.f32 %v1224_v2, %v682_v7 }
 0x1af   : > { %v693_v12 = vmul.f32 %v690_v9, %v690_v9 }
 0x1b0   : > { %v698_v13 = vadd.f32 %v697_v10, %v696_v8  ;;  %v694_v14 = vmul.f32 %v691_v11, %v691_v11 }
 0x1b1   : > { %v704_v15 = vsel %vm703_vm4, %v693_v12, 0.0 }
 0x1b2   : > { %v699_v16 = vrot.slane %v698_v13, 2  ;;  %v705_v17 = vrot.slane %v704_v15, 4  ;;  %v712_v18 = vsel %vm711_vm5, %v694_v14, 0.0 }
 0x1b3   : > { %v713_v19 = vrot.slane %v712_v18, 4 }
 0x1b4   : > { %v700_v20 = vadd.f32 %v699_v16, %v698_v13  ;;  %v706_v21 = vadd.f32 %v705_v17, %v704_v15 }
 0x1b5   : > { %v714_v22 = vadd.f32 %v713_v19, %v712_v18 }
 0x1b6   : > { %v701_v24 = vrot.slane %v700_v20, 1  ;;  %v707_v25 = vrot.slane %v706_v21, 2 }
 0x1b7   : > { %v715_v23 = vrot.slane %v714_v22, 2 }
 0x1b8   : > { %v702_v27 = vadd.f32 %v701_v24, %v700_v20  ;;  %v708_v28 = vadd.f32 %v707_v25, %v706_v21 }
 0x1b9   : > { %v716_v30 = vadd.f32 %v715_v23, %v714_v22 }
 0x1ba   : > { %v719_v31 = vmax.f32 %v702_v27, 1e-24  ;;  %v709_v2 = vrot.slane %v708_v28, 1 }
 0x1bb   : > { %v717_v32 = vrot.slane %v716_v30, 1 }
 0x1bc   : > { %v710_v33 = vadd.f32 %v709_v2, %v708_v28  ;;  %915 = vrsqrt.f32 %v719_v31 }
 0x1bd   : > { %v718_v34 = vadd.f32 %v717_v32, %v716_v30 }
 0x1be   : > { %v720_v35 = vmax.f32 %v710_v33, 1e-24 }
 0x1bf   : > { %v721_v36 = vmax.f32 %v718_v34, 1e-24 }
 0x1c0   : > { %917 = vrsqrt.f32 %v720_v35 }
 0x1c1   : > { %919 = vrsqrt.f32 %v721_v36 }
 0x1c6   : > { %v916_v37 = vpop.eup %915 }
 0x1c7   : > { %v725_v39 = vmul.f32 %v916_v37, %v689_v61 }
 0x1ca   : > { %v918_v38 = vpop.eup %917 }
 0x1cb   : > { %v920_v26 = vpop.eup %919  ;;  %v726_v40 = vmul.f32 %v918_v38, %v690_v9 }
 0x1cc   : > { %v727_v41 = vmul.f32 %v920_v26, %v691_v11 }
 0x1cd   : > { %v731_v42 = vcombine.low %v725_v39, %v726_v40 }
 0x1ce   : > { %734 = vrot.lane.b32.xlu0 %v727_v41, %s1010_s25 }
 0x1cf   : > { %732 = vrot.lane.b32.xlu1 %v731_v42, %s1010_s25 }
 0x240   : > { %v735_v43 = vpop.permute.xlu0 %734 }
 0x241   : > { %v737_v44 = vrot.slane %v735_v43, 4  ;;  %v733_v45 = vpop.permute.xlu1 %732 }
 0x242   : > { %v736_v46 = vrot.slane %v733_v45, 4 }
 0x244   : > { %v738_v29 = vsel %vm258_vm1, %v736_v46, %v737_v44 }
 0x245   : > { %v739_v47 = vsel %vm326_vm0, %v733_v45, %v738_v29 }
 0x246   : > { %741 = vst [vmem:[%s231_s13] sm:$0x77] %v739_v47 }
 0x247 PF: > { %s17_s20 = sadd.s32 1, %s1001_s20   ;;  %s1274_s15 = smov %s985_s16 }
 0x248   : > { %p14_p9 = scmp.ge.s32.totalorder %s17_s20, 4   ;;  %s1275_s16 = smov %s989_s17 }
 0x249   : > { %s1276_s17 = smov %s1092_s27  ;;  %s1277_s18 = smov %s997_s19 }
 0x24a   : > { %s1278_s19 = smov %s1280_s22  ;;  %16 = sbr.rel (!%p14_p9) target bundleno = 4 (0x4), region = 89 }
 0x251   :  { %763 = vsyncpa [#allocation4], 1 }
 0x252   :  { %765 = vsyncpa [#allocation4 + $0x1], 1 }

</bundles_post_ra>
